<compile_context>
chip_gen: v7x
topology: tpu7x:2x2x1
jax: 0.10.0
libtpu: 0.0.40
codegen_flags: <defaults>
</compile_context>

<pallas_src>
import functools

import jax
import jax.numpy as jnp
import numpy as np
from jax.experimental import pallas as pl
from jax.experimental.pallas import tpu as pltpu


# -----------------------------------------------------------------------------
# small helpers
# -----------------------------------------------------------------------------
def _pair(v):
    if isinstance(v, (tuple, list)):
        assert len(v) == 2
        return tuple(v)
    return (v, v)


def _quadruple(v):
    if isinstance(v, (tuple, list)):
        assert len(v) == 4
        return tuple(v)
    return (v, v, v, v)


def _round_up(x, m):
    return ((x + m - 1) // m) * m


def _tpu_vmem_capacity():
    try:
        return int(pltpu.get_tpu_info().vmem_capacity_bytes)
    except Exception:
        return 128 << 20


_VMEM_CAP = _tpu_vmem_capacity()
# v7x proxy: 64 MiB VMEM per TensorCore and 2 TCs per chip -> prefer >=2-step
# grids so the second core is not idle, and keep the scoped VMEM request low.
_TWO_CORE = _VMEM_CAP <= (64 << 20)
_VMEM_SAFE_CAP = min((_VMEM_CAP * 3) // 4, 96 << 20)


# -----------------------------------------------------------------------------
# MedianPool2d as a Pallas TPU kernel
# -----------------------------------------------------------------------------
_LANES = 128   # vreg lane width
_SUB = 8       # sublane sub-tile: one (8, 128) f32 vreg per window element


def _select_lower_median(loaders):
    """Elementwise lower median (sorted index (kk-1)//2) of kk same-shape arrays.

    `loaders` is a list of zero-arg callables that load the window elements.
    Forgetful selection: elements are pulled in lazily, and each round a
    multiset-preserving compare-exchange tournament places the working-set min
    and max at known slots; extremes that provably cannot be the rank-r element
    are discarded. Live set stays <= kk//2 + 2 values (bounded vreg pressure),
    min/max count is ~2.5x below a full odd-even transposition sort.
    NOTE: jnp.minimum/maximum NaN propagation differs from torch.median if the
    input contains NaNs (e.g. invalid depth pixels).
    """
    kk = len(loaders)
    if kk == 1:
        return loaders[0]()

    r = (kk - 1) // 2           # 0-based target rank (torch lower-median)
    n = kk                      # elements not yet discarded
    work = []                   # live values
    queue = list(loaders)       # not-yet-loaded values

    def ce(i, j):
        # compare-exchange (multiset preserving): min -> slot i, max -> slot j
        a, b = work[i], work[j]
        work[i] = jnp.minimum(a, b)
        work[j] = jnp.maximum(a, b)

    while n > 1:
        # refill working set so both extremes can (normally) be discarded
        need = min(max(n - r + 1, r + 2), n)
        while len(work) < need and queue:
            work.append(queue.pop(0)())
        s = len(work)

        # --- multiset-preserving min/max extraction (pairwise + tournaments) ---
        min_slots, max_slots = [], []
        for i in range(0, s - 1, 2):
            ce(i, i + 1)
            min_slots.append(i)
            max_slots.append(i + 1)
        if s % 2 == 1:
            min_slots.append(s - 1)
            max_slots.append(s - 1)

        while len(min_slots) > 1:
            nxt = []
            for j in range(0, len(min_slots) - 1, 2):
                a, b = min_slots[j], min_slots[j + 1]
                ce(a, b)                      # min ends up in slot a
                nxt.append(a)
            if len(min_slots) % 2 == 1:
                nxt.append(min_slots[-1])
            min_slots = nxt
        while len(max_slots) > 1:
            nxt = []
            for j in range(0, len(max_slots) - 1, 2):
                a, b = max_slots[j], max_slots[j + 1]
                ce(a, b)                      # max ends up in slot b
                nxt.append(b)
            if len(max_slots) % 2 == 1:
                nxt.append(max_slots[-1])
            max_slots = nxt
        min_slot, max_slot = min_slots[0], max_slots[0]

        # --- discard extremes that provably cannot be the rank-r element -------
        drop_min = s >= n - r + 1     # working-set min is strictly below rank r
        drop_max = s >= r + 2         # working-set max is strictly above rank r
        drop = []
        if drop_min:
            drop.append(min_slot)
        if drop_max:
            drop.append(max_slot)
        for slot in sorted(drop, reverse=True):
            work.pop(slot)
        if drop_min:
            n -= 1
            r -= 1
        if drop_max:
            n -= 1

    return work[0]


def _median_pool_kernel(x_ref, o_ref, *, kk, br):
    """x_ref: (kk, br, 128) window-major block; o_ref: (br, 128).

    Pure elementwise VPU work on (8, 128) sub-tiles: full 128-lane stores, no
    cross-lane shifts, no masked stores. Inputs are loaded lazily per sub-tile.
    Sub-tiles are iterated with a visible fori_loop so only one sub-tile's
    working set (~kk/2+2 vregs) is live at a time (no spills for kk=64).
    """
    # TODO(synk): for bf16 inputs on v5e (no bf16 VALU), upcast loaders to f32.
    nsub = br // _SUB
    if nsub == 1:
        loaders = [(lambda i=i: x_ref[i]) for i in range(kk)]
        o_ref[...] = _select_lower_median(loaders)
    else:
        def body(t, carry):
            r0 = pl.multiple_of(t * _SUB, _SUB)
            sl = pl.ds(r0, _SUB)
            loaders = [(lambda i=i, sl=sl: x_ref[i, sl, :]) for i in range(kk)]
            o_ref[sl, :] = _select_lower_median(loaders)
            return carry
        jax.lax.fori_loop(0, nsub, body, 0)


def median_pool2d(x, kernel_size=3, stride=1, padding=0, same=False):
    """Pallas implementation of MedianPool2d.forward. x: (N, C, H, W)."""
    kh, kw = _pair(kernel_size)
    sh, sw = _pair(stride)
    n, c, ih, iw = x.shape

    if same:
        ph = max(kh - sh, 0) if ih % sh == 0 else max(kh - ih % sh, 0)
        pw = max(kw - sw, 0) if iw % sw == 0 else max(kw - iw % sw, 0)
        p_l = pw // 2
        p_r = pw - p_l
        p_t = ph // 2
        p_b = ph - p_t
        pad = (p_l, p_r, p_t, p_b)
    else:
        pad = _quadruple(padding)
    p_l, p_r, p_t, p_b = pad
    if any(pad):
        x = jnp.pad(x, ((0, 0), (0, 0), (p_t, p_b), (p_l, p_r)), mode="reflect")

    hp, wp = ih + p_t + p_b, iw + p_l + p_r
    ho = (hp - kh) // sh + 1
    wo = (wp - kw) // sw + 1
    kk = kh * kw
    m = n * c * ho * wo

    # Wrapper-side layout plumbing: window-major, lane-dense slab.
    # wmajor[i, ...] is window element i of every output pixel; all (n, c)
    # planes and output pixels are flattened onto the (lane-dense) last axis.
    if sh == kh and sw == kw:
        # Non-overlapping windows (the module's 8x8 / stride 8 case): a single
        # reshape + transpose replaces the kk-slice stack -> one fused HBM copy.
        xc = x[:, :, : ho * kh, : wo * kw]
        wmajor = (xc.reshape(n, c, ho, kh, wo, kw)
                  .transpose(3, 5, 0, 1, 2, 4)
                  .reshape(kk, m))
    else:
        wins = []
        for di in range(kh):
            for dj in range(kw):
                wins.append(
                    jax.lax.slice(
                        x,
                        (0, 0, di, dj),
                        (n, c, di + (ho - 1) * sh + 1, dj + (wo - 1) * sw + 1),
                        (1, 1, sh, sw),
                    )
                )
        wmajor = jnp.stack(wins, axis=0).reshape(kk, m)

    r_needed = pl.cdiv(m, _LANES)
    # Small windows (kk<=16) are HBM-bound: use a big 256-row block. Large
    # windows (kk=64) are capped at 64 rows to bound VMEM / vreg pressure.
    br_cap = 256 if kk <= 16 else 64
    br = min(_round_up(r_needed, _SUB), br_cap)
    # On 2-TC chips (v7x) prefer a >=2-step grid so both cores get work.
    if _TWO_CORE and br >= 2 * _SUB and _round_up(r_needed, br) // br < 2:
        br = _round_up(pl.cdiv(r_needed, 2), _SUB)
    rr = _round_up(r_needed, br)
    m_pad = rr * _LANES
    if m_pad != m:
        wmajor = jnp.pad(wmajor, ((0, 0), (0, m_pad - m)))   # padded lanes discarded
    wmajor = wmajor.reshape(kk, rr, _LANES)

    itemsize = jnp.dtype(wmajor.dtype).itemsize
    in_block = kk * br * _LANES * itemsize
    out_block = br * _LANES * itemsize
    # double-buffered in/out blocks + margin, capped below physical VMEM
    # (<= 48 MiB on v7x, <= 96 MiB on v5e/v6e).
    vmem_bytes = int(min(max(4 * (in_block + out_block) + (2 << 20), 8 << 20),
                         _VMEM_SAFE_CAP))

    out = pl.pallas_call(
        functools.partial(_median_pool_kernel, kk=kk, br=br),
        out_shape=jax.ShapeDtypeStruct((rr, _LANES), x.dtype),
        grid_spec=pltpu.PrefetchScalarGridSpec(
            num_scalar_prefetch=0,
            grid=(rr // br,),
            in_specs=[pl.BlockSpec((kk, br, _LANES), lambda i: (0, i, 0))],
            out_specs=pl.BlockSpec((br, _LANES), lambda i: (i, 0)),
        ),
        compiler_params=pltpu.CompilerParams(
            dimension_semantics=("parallel",),
            vmem_limit_bytes=vmem_bytes,
        ),
    )(wmajor)

    return out.reshape(m_pad)[:m].reshape(n, c, ho, wo)


def _median_pool2d_ref(x, kernel_size=3, stride=1, padding=0, same=False):
    """Pure-JAX reference matching the PyTorch module semantics (lower median)."""
    kh, kw = _pair(kernel_size)
    sh, sw = _pair(stride)
    n, c, ih, iw = x.shape
    if same:
        ph = max(kh - sh, 0) if ih % sh == 0 else max(kh - ih % sh, 0)
        pw = max(kw - sw, 0) if iw % sw == 0 else max(kw - iw % sw, 0)
        p_l = pw // 2
        p_r = pw - p_l
        p_t = ph // 2
        p_b = ph - p_t
        pad = (p_l, p_r, p_t, p_b)
    else:
        pad = _quadruple(padding)
    p_l, p_r, p_t, p_b = pad
    if any(pad):
        x = jnp.pad(x, ((0, 0), (0, 0), (p_t, p_b), (p_l, p_r)), mode="reflect")
    hp, wp = ih + p_t + p_b, iw + p_l + p_r
    ho = (hp - kh) // sh + 1
    wo = (wp - kw) // sw + 1
    wins = []
    for di in range(kh):
        for dj in range(kw):
            wins.append(
                jax.lax.slice(
                    x,
                    (0, 0, di, dj),
                    (n, c, di + (ho - 1) * sh + 1, dj + (wo - 1) * sw + 1),
                    (1, 1, sh, sw),
                )
            )
    stacked = jnp.stack(wins, axis=-1)
    srt = jnp.sort(stacked, axis=-1)
    return srt[..., (kh * kw - 1) // 2]


# -----------------------------------------------------------------------------
# Fused linear + PReLU Pallas kernel (bf16 MXU, f32 accumulation)
# -----------------------------------------------------------------------------
def _linear_prelu_kernel(x_ref, w_ref, b_ref, o_ref, *, alpha):
    # bf16 operands -> native MXU rate; f32 accumulation.
    y = jnp.dot(x_ref[...].astype(jnp.bfloat16),
                w_ref[...].astype(jnp.bfloat16),
                preferred_element_type=jnp.float32)
    y = y + b_ref[...]
    if alpha != 1.0:                       # PReLU (alpha baked; 1.0 -> identity)
        y = jnp.where(y >= 0.0, y, jnp.float32(alpha) * y)
    o_ref[...] = y.astype(o_ref.dtype)


def linear_prelu(x, w, b, alpha=1.0):
    """y = PReLU(x @ w + b) with scalar alpha (nn.PReLU() default has a single
    shared parameter); alpha=1.0 gives a plain affine."""
    m, kin = x.shape
    kin2, nout = w.shape
    assert kin == kin2
    # 256-row M tile feeds the 256-wide MXUs on v6e/v7x and amortizes per-step
    # overhead; on v5e a taller-than-128 tile is harmless (LHS rows stream).
    bm = min(256, _round_up(m, _SUB))
    if _TWO_CORE and bm >= 2 * _SUB and pl.cdiv(m, bm) < 2:
        bm = _round_up(pl.cdiv(m, 2), _SUB)     # >=2 grid steps for the 2nd TC
    grid_m = pl.cdiv(m, bm)                     # ragged last block handled by Pallas
    b2 = b.reshape(1, nout).astype(jnp.float32)

    # TODO(synk): add a K grid axis + f32 VMEM accumulator if kin*nout weights
    # ever approach the v7x scoped-VMEM budget; current weights are <= 1.2 MiB.
    out = pl.pallas_call(
        functools.partial(_linear_prelu_kernel, alpha=float(alpha)),
        out_shape=jax.ShapeDtypeStruct((m, nout), x.dtype),
        grid_spec=pltpu.PrefetchScalarGridSpec(
            num_scalar_prefetch=0,
            grid=(grid_m,),
            in_specs=[
                pl.BlockSpec((bm, kin), lambda i: (i, 0)),
                pl.BlockSpec((kin, nout), lambda i: (0, 0)),
                pl.BlockSpec((1, nout), lambda i: (0, 0)),
            ],
            out_specs=pl.BlockSpec((bm, nout), lambda i: (i, 0)),
        ),
        compiler_params=pltpu.CompilerParams(
            dimension_semantics=("parallel",),
        ),
    )(x, w, b2)
    return out


def _linear_prelu_ref(x, w, b, alpha=1.0):
    y = x @ w + b.reshape(1, -1)
    return jnp.where(y >= 0.0, y, alpha * y)


# -----------------------------------------------------------------------------
# Direct 3x3 "same" conv Pallas kernel (no im2col materialization in HBM)
# -----------------------------------------------------------------------------
def _conv3x3_kernel(x_ref, w_ref, b_ref, o_ref, *, h, w, cin, cout):
    """x_ref: (1, (h+3)*(w+2), cin) zero-padded, spatially flattened NHWC tile
    for one batch element. Tap (di, dj) is a contiguous row window at static
    offset di*(w+2)+dj; the 9 taps are reduced in VMEM with bf16 MXU matmuls
    and an f32 accumulator. Two junk columns per output row (from the W pad)
    are sliced off in the wrapper."""
    rows = h * (w + 2)
    acc = jnp.zeros((rows, cout), jnp.float32)
    for di in range(3):
        for dj in range(3):
            base = di * (w + 2) + dj
            xt = x_ref[0, base:base + rows, :].astype(jnp.bfloat16)
            acc = acc + jnp.dot(xt, w_ref[di * 3 + dj].astype(jnp.bfloat16),
                                preferred_element_type=jnp.float32)
    o_ref[0] = (acc + b_ref[...]).astype(o_ref.dtype)


def conv2d_3x3_same(x, w, b):
    """3x3 / stride 1 / pad 1 conv (NCHW input, OIHW weights)."""
    n, cin, h, wdt = x.shape
    cout = w.shape[0]
    wp2 = wdt + 2
    rows = h * wp2
    # NHWC + zero 'same' padding; one extra bottom row keeps the last tap's row
    # window in-bounds (it only ever feeds the discarded junk columns).
    xh = jnp.pad(x.transpose(0, 2, 3, 1), ((0, 0), (1, 2), (1, 1), (0, 0)))
    xh = xh.reshape(n, (h + 3) * wp2, cin)
    wt = w.transpose(2, 3, 1, 0).reshape(9, cin, cout)        # (9, Cin, Cout)
    b2 = b.reshape(1, cout).astype(jnp.float32)

    # TODO(synk): for large spatial sizes, tile the row axis (with a 2-row halo)
    # instead of keeping the full per-batch plane resident in VMEM.
    out = pl.pallas_call(
        functools.partial(_conv3x3_kernel, h=h, w=wdt, cin=cin, cout=cout),
        out_shape=jax.ShapeDtypeStruct((n, rows, cout), x.dtype),
        grid_spec=pltpu.PrefetchScalarGridSpec(
            num_scalar_prefetch=0,
            grid=(n,),
            in_specs=[
                pl.BlockSpec((1, (h + 3) * wp2, cin), lambda i: (i, 0, 0)),
                pl.BlockSpec((9, cin, cout), lambda i: (0, 0, 0)),
                pl.BlockSpec((1, cout), lambda i: (0, 0)),
            ],
            out_specs=pl.BlockSpec((1, rows, cout), lambda i: (i, 0, 0)),
        ),
        compiler_params=pltpu.CompilerParams(
            dimension_semantics=("parallel",),
        ),
    )(xh, wt, b2)
    # drop the 2 junk columns per row that came from the W padding
    return out.reshape(n, h, wp2, cout)[:, :, :wdt, :].transpose(0, 3, 1, 2)


def _conv2d_3x3_same_ref(x, w, b):
    y = jax.lax.conv_general_dilated(
        x, w, window_strides=(1, 1), padding=((1, 1), (1, 1)),
        dimension_numbers=("NCHW", "OIHW", "NCHW"))
    return y + b.reshape(1, -1, 1, 1)


# -----------------------------------------------------------------------------
# EnetGnn forward (glue in plain JAX, heavy ops in the Pallas kernels above)
# -----------------------------------------------------------------------------
def get_knn_indices(batch_mat, k):
    """batch_mat: (N, HW, 3) -> (N, HW, k) indices of the k nearest points."""
    r = jnp.einsum("nij,nkj->nik", batch_mat, batch_mat)         # (N, HW, HW)
    diag = jnp.diagonal(r, axis1=1, axis2=2)                     # (N, HW)
    d2 = diag[:, :, None] + diag[:, None, :] - 2.0 * r
    d = jnp.sqrt(jnp.maximum(d2, 0.0))   # clamp fp negatives (torch may NaN here)
    _, idx = jax.lax.top_k(-d, k)        # k smallest distances
    return idx


def enet_gnn_forward(params, cnn_encoder_output, original_input, gnn_iterations,
                     k, xy, *, median_fn, linear_fn, conv_fn):
    n, c, h, w = cnn_encoder_output.shape
    hw = h * w

    depth = original_input[:, 3:4]
    # One batched median-pool call over (x, y, depth); identical values to the
    # module's three separate calls, but better lane utilization.
    pooled = median_fn(
        jnp.concatenate([xy[:, 0:1], xy[:, 1:2], depth], axis=1),
        kernel_size=8, stride=8, padding=0, same=False)          # (N, 3, h, w)
    proj_3d = pooled.reshape(n, 3, hw).transpose(0, 2, 1)        # (N, HW, 3)

    knn = get_knn_indices(proj_3d, k).reshape(n, hw * k)         # (N, HW*K)

    h_feat = cnn_encoder_output.transpose(0, 2, 3, 1).reshape(n, hw, c)
    for _ in range(gnn_iterations):
        nb = jax.vmap(lambda hf, idx: hf[idx])(h_feat, knn)      # (N, HW*K, C)
        nbf = nb.reshape(n * hw * k, c)
        for (wg, bg, ag) in params["g_layers"]:
            nbf = linear_fn(nbf, wg, bg, ag)
        m = nbf.reshape(n, hw, k, c).mean(axis=2)                # (N, HW, C)
        concat = jnp.concatenate([h_feat, m], axis=2).reshape(n * hw, 2 * c)
        h_feat = linear_fn(concat, params["q_w"], params["q_b"], params["q_alpha"])
        h_feat = h_feat.reshape(n, hw, c)

    h_img = h_feat.reshape(n, h, w, c).transpose(0, 3, 1, 2)
    cat = jnp.concatenate([cnn_encoder_output, h_img], axis=1)   # (N, 2C, h, w)
    return conv_fn(cat, params["conv_w"], params["conv_b"])


# -----------------------------------------------------------------------------
# main
# -----------------------------------------------------------------------------
if __name__ == "__main__":
    key = jax.random.PRNGKey(0)
    ks = jax.random.split(key, 14)

    # ---- unit checks: MedianPool2d Pallas kernel vs jnp.sort reference --------
    xm = jax.random.normal(ks[0], (2, 4, 16, 16), jnp.float32)
    out_a = jax.block_until_ready(median_pool2d(xm, kernel_size=3, stride=1))
    ref_a = _median_pool2d_ref(xm, kernel_size=3, stride=1)
    assert out_a.shape == (2, 4, 14, 14), out_a.shape
    assert jnp.allclose(out_a, ref_a, atol=1e-6, rtol=1e-6)

    xm2 = jax.random.normal(ks[1], (2, 3, 32, 32), jnp.float32)
    out_b = jax.block_until_ready(median_pool2d(xm2, kernel_size=8, stride=8))
    ref_b = _median_pool2d_ref(xm2, kernel_size=8, stride=8)
    assert out_b.shape == (2, 3, 4, 4), out_b.shape
    assert jnp.allclose(out_b, ref_b, atol=1e-6, rtol=1e-6)

    # ---- unit check: fused linear + PReLU kernel (bf16 MXU) -------------------
    xl = jax.random.normal(ks[2], (32, 256), jnp.float32)
    wl = jax.random.normal(ks[3], (256, 128), jnp.float32) / np.sqrt(256.0)
    bl = jax.random.normal(ks[4], (128,), jnp.float32) * 0.01
    yl = jax.block_until_ready(linear_prelu(xl, wl, bl, 0.25))
    assert jnp.allclose(yl, _linear_prelu_ref(xl, wl, bl, 0.25), atol=5e-2, rtol=5e-2)

    # ---- unit check: direct 3x3 conv kernel -----------------------------------
    xc = jax.random.normal(ks[9], (2, 32, 5, 5), jnp.float32)
    wc = jax.random.normal(ks[10], (128, 32, 3, 3), jnp.float32) / np.sqrt(32 * 9)
    bc = jax.random.normal(ks[11], (128,), jnp.float32) * 0.01
    yc = jax.block_until_ready(conv2d_3x3_same(xc, wc, bc))
    rc = _conv2d_3x3_same_ref(xc, wc, bc)
    assert yc.shape == rc.shape, (yc.shape, rc.shape)
    assert jnp.allclose(yc, rc, atol=5e-2, rtol=5e-2), float(jnp.max(jnp.abs(yc - rc)))

    # ---- EnetGnn forward --------------------------------------------------------
    N, C, H, W = 2, 128, 4, 4
    mlp_num_layers, gnn_iterations, K = 1, 2, 4

    cnn_encoder_output = jax.random.normal(ks[5], (N, C, H, W), jnp.float32)
    original_input = jax.random.normal(ks[6], (N, 4, 8 * H, 8 * W), jnp.float32)
    xy = jax.random.normal(ks[7], (N, 2, 8 * H, 8 * W), jnp.float32)

    pk = jax.random.split(ks[8], 2 * mlp_num_layers + 4)
    g_layers = []
    for layer in range(mlp_num_layers):
        wg = jax.random.normal(pk[2 * layer], (C, C), jnp.float32) / np.sqrt(C)
        bg = jax.random.normal(pk[2 * layer + 1], (C,), jnp.float32) * 0.01
        g_layers.append((wg, bg, 0.25))
    params = {
        "g_layers": g_layers,
        "q_w": jax.random.normal(pk[-4], (2 * C, C), jnp.float32) / np.sqrt(2 * C),
        "q_b": jax.random.normal(pk[-3], (C,), jnp.float32) * 0.01,
        "q_alpha": 0.25,
        "conv_w": jax.random.normal(pk[-2], (C, 2 * C, 3, 3), jnp.float32) / np.sqrt(2 * C * 9),
        "conv_b": jax.random.normal(pk[-1], (C,), jnp.float32) * 0.01,
    }

    out = enet_gnn_forward(
        params, cnn_encoder_output, original_input, gnn_iterations, K, xy,
        median_fn=median_pool2d, linear_fn=linear_prelu, conv_fn=conv2d_3x3_same)
    out = jax.block_until_ready(out)

    ref = enet_gnn_forward(
        params, cnn_encoder_output, original_input, gnn_iterations, K, xy,
        median_fn=_median_pool2d_ref, linear_fn=_linear_prelu_ref,
        conv_fn=_conv2d_3x3_same_ref)

    assert out.shape == (N, C, H, W), out.shape
    assert jnp.allclose(out, ref, atol=1e-1, rtol=1e-1), float(jnp.max(jnp.abs(out - ref)))

    print("KERNEL_OK")
</pallas_src>

<mosaic_0001>
module attributes {stable_mosaic.version = 11 : i64} {
  func.func @_median_pool_kernel(%arg0: i32, %arg1: memref<9x16x128xf32, #tpu.memory_space<vmem>>, %arg2: memref<16x128xf32, #tpu.memory_space<vmem>>) attributes {dimension_semantics = [#tpu.dimension_semantics<parallel>], iteration_bounds = array<i64: 1>, scalar_prefetch = 0 : i64, scratch_operands = 0 : i64, tpu.core_type = #tpu.core_type<tc>, window_params = [{transform_indices = @transform_0, window_bounds = array<i64: 9, 16, 128>}, {transform_indices = @transform_1, window_bounds = array<i64: 16, 128>}]} {
    %c0_i32 = arith.constant 0 : i32
    %c2_i32 = arith.constant 2 : i32
    %0 = arith.addi %c0_i32, %c2_i32 : i32
    %c1_i32 = arith.constant 1 : i32
    scf.for %arg3 = %c0_i32 to %0 step %c1_i32  : i32 {
      %c8_i32 = arith.constant 8 : i32
      %1 = arith.muli %arg3, %c8_i32 : i32
      %2 = tpu.assume_multiple %1, 8 : i32
      %c0 = arith.constant 0 : index
      %3 = arith.index_cast %2 : i32 to index
      %c0_1 = arith.constant 0 : index
      %4 = vector.load %arg1[%c0, %3, %c0_1] : memref<9x16x128xf32, #tpu.memory_space<vmem>>, vector<1x8x128xf32>
      %5 = vector.shape_cast %4 : vector<1x8x128xf32> to vector<8x128xf32>
      %c1 = arith.constant 1 : index
      %6 = arith.index_cast %2 : i32 to index
      %c0_2 = arith.constant 0 : index
      %7 = vector.load %arg1[%c1, %6, %c0_2] : memref<9x16x128xf32, #tpu.memory_space<vmem>>, vector<1x8x128xf32>
      %8 = vector.shape_cast %7 : vector<1x8x128xf32> to vector<8x128xf32>
      %c2 = arith.constant 2 : index
      %9 = arith.index_cast %2 : i32 to index
      %c0_3 = arith.constant 0 : index
      %10 = vector.load %arg1[%c2, %9, %c0_3] : memref<9x16x128xf32, #tpu.memory_space<vmem>>, vector<1x8x128xf32>
      %11 = vector.shape_cast %10 : vector<1x8x128xf32> to vector<8x128xf32>
      %c3 = arith.constant 3 : index
      %12 = arith.index_cast %2 : i32 to index
      %c0_4 = arith.constant 0 : index
      %13 = vector.load %arg1[%c3, %12, %c0_4] : memref<9x16x128xf32, #tpu.memory_space<vmem>>, vector<1x8x128xf32>
      %14 = vector.shape_cast %13 : vector<1x8x128xf32> to vector<8x128xf32>
      %c4 = arith.constant 4 : index
      %15 = arith.index_cast %2 : i32 to index
      %c0_5 = arith.constant 0 : index
      %16 = vector.load %arg1[%c4, %15, %c0_5] : memref<9x16x128xf32, #tpu.memory_space<vmem>>, vector<1x8x128xf32>
      %17 = vector.shape_cast %16 : vector<1x8x128xf32> to vector<8x128xf32>
      %c5 = arith.constant 5 : index
      %18 = arith.index_cast %2 : i32 to index
      %c0_6 = arith.constant 0 : index
      %19 = vector.load %arg1[%c5, %18, %c0_6] : memref<9x16x128xf32, #tpu.memory_space<vmem>>, vector<1x8x128xf32>
      %20 = vector.shape_cast %19 : vector<1x8x128xf32> to vector<8x128xf32>
      %21 = arith.minimumf %5, %8 : vector<8x128xf32>
      %22 = arith.maximumf %5, %8 : vector<8x128xf32>
      %23 = arith.minimumf %11, %14 : vector<8x128xf32>
      %24 = arith.maximumf %11, %14 : vector<8x128xf32>
      %25 = arith.minimumf %17, %20 : vector<8x128xf32>
      %26 = arith.maximumf %17, %20 : vector<8x128xf32>
      %27 = arith.minimumf %21, %23 : vector<8x128xf32>
      %28 = arith.maximumf %21, %23 : vector<8x128xf32>
      %29 = arith.maximumf %27, %25 : vector<8x128xf32>
      %30 = arith.minimumf %22, %24 : vector<8x128xf32>
      %31 = arith.maximumf %22, %24 : vector<8x128xf32>
      %32 = arith.minimumf %31, %26 : vector<8x128xf32>
      %c6 = arith.constant 6 : index
      %33 = arith.index_cast %2 : i32 to index
      %c0_7 = arith.constant 0 : index
      %34 = vector.load %arg1[%c6, %33, %c0_7] : memref<9x16x128xf32, #tpu.memory_space<vmem>>, vector<1x8x128xf32>
      %35 = vector.shape_cast %34 : vector<1x8x128xf32> to vector<8x128xf32>
      %36 = arith.minimumf %30, %28 : vector<8x128xf32>
      %37 = arith.maximumf %30, %28 : vector<8x128xf32>
      %38 = arith.minimumf %32, %29 : vector<8x128xf32>
      %39 = arith.maximumf %32, %29 : vector<8x128xf32>
      %40 = arith.minimumf %36, %38 : vector<8x128xf32>
      %41 = arith.maximumf %36, %38 : vector<8x128xf32>
      %42 = arith.maximumf %40, %35 : vector<8x128xf32>
      %43 = arith.minimumf %37, %39 : vector<8x128xf32>
      %44 = arith.maximumf %37, %39 : vector<8x128xf32>
      %45 = arith.minimumf %44, %42 : vector<8x128xf32>
      %c7 = arith.constant 7 : index
      %46 = arith.index_cast %2 : i32 to index
      %c0_8 = arith.constant 0 : index
      %47 = vector.load %arg1[%c7, %46, %c0_8] : memref<9x16x128xf32, #tpu.memory_space<vmem>>, vector<1x8x128xf32>
      %48 = vector.shape_cast %47 : vector<1x8x128xf32> to vector<8x128xf32>
      %49 = arith.minimumf %43, %41 : vector<8x128xf32>
      %50 = arith.maximumf %43, %41 : vector<8x128xf32>
      %51 = arith.minimumf %45, %48 : vector<8x128xf32>
      %52 = arith.maximumf %45, %48 : vector<8x128xf32>
      %53 = arith.maximumf %49, %51 : vector<8x128xf32>
      %54 = arith.minimumf %50, %52 : vector<8x128xf32>
      %c8 = arith.constant 8 : index
      %55 = arith.index_cast %2 : i32 to index
      %c0_9 = arith.constant 0 : index
      %56 = vector.load %arg1[%c8, %55, %c0_9] : memref<9x16x128xf32, #tpu.memory_space<vmem>>, vector<1x8x128xf32>
      %57 = vector.shape_cast %56 : vector<1x8x128xf32> to vector<8x128xf32>
      %58 = arith.minimumf %54, %53 : vector<8x128xf32>
      %59 = arith.maximumf %54, %53 : vector<8x128xf32>
      %60 = arith.maximumf %58, %57 : vector<8x128xf32>
      %61 = arith.minimumf %59, %60 : vector<8x128xf32>
      %62 = arith.index_cast %2 : i32 to index
      %c0_10 = arith.constant 0 : index
      %63 = vector.load %arg2[%62, %c0_10] : memref<16x128xf32, #tpu.memory_space<vmem>>, vector<8x128xf32>
      tpu.vector_store %arg2[%62, %c0_10], %61 {strides = array<i32>} : memref<16x128xf32, #tpu.memory_space<vmem>>, vector<8x128xf32>,
    }
    %c2_i32_0 = arith.constant 2 : i32
    return
  }
  func.func @transform_0(%arg0: i32) -> (i32, i32, i32) {
    %c0_i32 = arith.constant 0 : i32
    %c0_i32_0 = arith.constant 0 : i32
    %c0_i32_1 = arith.constant 0 : i32
    return %c0_i32, %arg0, %c0_i32_0 : i32, i32, i32
  }
  func.func @transform_1(%arg0: i32) -> (i32, i32) {
    %c0_i32 = arith.constant 0 : i32
    %c0_i32_0 = arith.constant 0 : i32
    return %arg0, %c0_i32 : i32, i32
  }
}

</mosaic_0001>

<bundles_post_ra>
// kernel: tpu_custom_call.1
= control target key start
LH: loop header
LB: loop body
LE: loop exit
PB: predicated region body
PF: predicated region fallthrough
CT: control target
= control target key end

     0   :  { %6 = vsyncpa [#allocation3], 0  ;;  %s293_s0 = inlined_call_operand.hbm [shape: f32[9,16,128], index: 0, kind: input, shape index: {}]   ;;  %s294_s1 = inlined_call_operand.hbm [shape: f32[16,128], index: 1, kind: output, shape index: {}]  }
   0x1   :  { %7 = vsyncpa [#allocation4], 0  ;;  %s225_s6 = smov [#allocation2]   ;;  %s169_s10 = scalar_lea.hbm %s293_s0, 2304 }
   0x2   :  { %s13_s7 = sshll.u32 %s225_s6, 4  ;;  %p170_p0 = scmp.ne.s32.totalorder %s293_s0, %s169_s10  ;;  %s14_s7 = int_to_ptr.vmem [resolvable:$true] %s13_s7 }
   0x3   :  { %p173_p1 = scmp.lt.u32.totalorder %s169_s10, %s293_s0 }
   0x5   :  { %p175_p2 = pnand %p173_p1, %p170_p0 }
   0x7   :  { %178 = shalt.err (!%p175_p2)
}
   0x8   :  { %s179_s15 = scalar_lea.vmem %s14_s7, 2304  ;;  %p184_p4 = scmp.lt.s32.totalorder %s14_s7, %s14_s7 }
   0x9   :  { %p180_p3 = scmp.ne.s32.totalorder %s14_s7, %s179_s15  ;;  %p185_p5 = scmp.lt.s32.totalorder %s179_s15, %s179_s15 }
   0xb   :  { %p186_p6 = por %p185_p5, %p184_p4 }
   0xd   :  { %p187_p7 = pnand %p186_p6, %p180_p3 }
   0xf   :  { %190 = shalt.err (!%p187_p7)
}
  0x10   :  { %s226_s16 = smov 128   ;;  %s227_s17 = smov 8  }
  0x11   :  { %19 = dma.hbm_to_vmem [thread:$0]  %s293_s0, 2304, %s14_s7, [#allocation3], %s226_s16, %s226_s16, %s227_s17  }
  0x12   :  { %217 = dma.done.wait [#allocation3], 2304  }
  0x13   :  { %218 = vsyncadd [#allocation3], 4294964992  ;;  %s254_s20 = smov 0  }
  0x14 LB: > { %s140_s21 = sshll.u32 %s223_s20, 3  ;;  %s28_s20 = sadd.s32 1, %s223_s20   ;;  %s223_s20 = sphi %s254_s20, %s28_s20  }
  0x15   : > { %s262_s22 = scalar_lea.vmem [#allocation2], %s140_s21  ;;  %s88_s0 = scalar_lea.vmem [#allocation5], %s140_s21 }
  0x16   : > { %v31_v0 = vld [vmem:[%s262_s22] sm:$0xff]  ;;  %v142_v1 = vld [vmem:[%s262_s22 + $0x10] sm:$0xff]  ;;  %p25_p8 = scmp.ge.s32.totalorder %s28_s20, 2  }
  0x17   : > { %v144_v2 = vld [vmem:[%s262_s22 + $0x20] sm:$0xff]  ;;  %v146_v3 = vld [vmem:[%s262_s22 + $0x30] sm:$0xff]  ;;  %v47_v6 = vmin.f32 %v31_v0, %v142_v1  ;;  %v48_v7 = vmax.f32 %v31_v0, %v142_v1  ;;  %s228_s23 = smov (%p25_p8), [#allocation5]  }
  0x18   : > { %v148_v4 = vld [vmem:[%s262_s22 + $0x40] sm:$0xff]  ;;  %v150_v5 = vld [vmem:[%s262_s22 + $0x50] sm:$0xff]  ;;  %v49_v8 = vmin.f32 %v144_v2, %v146_v3  ;;  %v50_v9 = vmax.f32 %v144_v2, %v146_v3  ;;  %s95_s24 = sshll.u32 (%p25_p8), %s228_s23, 4  ;;  %s96_s24 = int_to_ptr.vmem [resolvable:$true] %s95_s24 }
  0x19   : > { %v51_v10 = vmin.f32 %v148_v4, %v150_v5  ;;  %v52_v11 = vmax.f32 %v148_v4, %v150_v5  ;;  %v152_v22 = vld [vmem:[%s262_s22 + $0x60] sm:$0xff]  ;;  %v154_v28 = vld [vmem:[%s262_s22 + $0x70] sm:$0xff]  ;;  %s191_s25 = scalar_lea.vmem (%p25_p8), %s96_s24, 256  ;;  %p196_p10 = scmp.lt.s32.totalorder (%p25_p8), %s96_s24, %s96_s24 }
  0x1a   : > { %v53_v12 = vmin.f32 %v47_v6, %v49_v8  ;;  %v54_v13 = vmax.f32 %v47_v6, %v49_v8  ;;  %v56_v14 = vmin.f32 %v48_v7, %v50_v9  ;;  %v57_v15 = vmax.f32 %v48_v7, %v50_v9  ;;  %v156_v36 = vld [vmem:[%s262_s22 + $0x80] sm:$0xff]  ;;  %p192_p9 = scmp.ne.s32.totalorder (%p25_p8), %s96_s24, %s191_s25  ;;  %p197_p11 = scmp.lt.s32.totalorder (%p25_p8), %s191_s25, %s191_s25 }
  0x1c   : > { %v55_v16 = vmax.f32 %v53_v12, %v51_v10  ;;  %v58_v17 = vmin.f32 %v57_v15, %v52_v11  ;;  %v62_v18 = vmin.f32 %v56_v14, %v54_v13  ;;  %v63_v19 = vmax.f32 %v56_v14, %v54_v13  ;;  %p198_p12 = por (%p25_p8), %p197_p11, %p196_p10 }
  0x1e   : > { %v64_v20 = vmin.f32 %v58_v17, %v55_v16  ;;  %v65_v21 = vmax.f32 %v58_v17, %v55_v16  ;;  %p199_p13 = pnand (%p25_p8), %p198_p12, %p192_p9 }
  0x20   : > { %v66_v23 = vmin.f32 %v62_v18, %v64_v20  ;;  %v67_v24 = vmax.f32 %v62_v18, %v64_v20  ;;  %v69_v25 = vmin.f32 %v63_v19, %v65_v21  ;;  %v70_v26 = vmax.f32 %v63_v19, %v65_v21 }
  0x22   : > { %v68_v27 = vmax.f32 %v66_v23, %v152_v22  ;;  %v75_v30 = vmin.f32 %v69_v25, %v67_v24  ;;  %v76_v31 = vmax.f32 %v69_v25, %v67_v24 }
  0x24   : > { %v71_v29 = vmin.f32 %v70_v26, %v68_v27 }
  0x26   : > { %v77_v32 = vmin.f32 %v71_v29, %v154_v28  ;;  %v78_v33 = vmax.f32 %v71_v29, %v154_v28 }
  0x28   : > { %v79_v34 = vmax.f32 %v75_v30, %v77_v32  ;;  %v80_v35 = vmin.f32 %v76_v31, %v78_v33 }
  0x2a   : > { %v84_v37 = vmin.f32 %v80_v35, %v79_v34  ;;  %v85_v38 = vmax.f32 %v80_v35, %v79_v34  ;;  %27 = sbr.rel (!%p25_p8) target bundleno = 20 (0x14), region = 45 }
  0x2c   : > { %v86_v39 = vmax.f32 %v84_v37, %v156_v36 }
  0x2e   : > { %v87_v40 = vmin.f32 %v85_v38, %v86_v39 }
  0x30   : > { %89 = vst [vmem:[%s88_s0] sm:$0xff] %v87_v40 }
  0x31   :  { %202 = shalt.err (!%p199_p13)
}
  0x32   :  { %s203_s28 = scalar_lea.hbm %s294_s1, 256 }
  0x33   :  { %p204_p0 = scmp.ne.s32.totalorder %s294_s1, %s203_s28  ;;  %p207_p1 = scmp.lt.u32.totalorder %s203_s28, %s294_s1 }
  0x35   :  { %p209_p2 = pnand %p207_p1, %p204_p0 }
  0x37   :  { %212 = shalt.err (!%p209_p2)
}
  0x38   :  { %101 = dma.vmem_to_hbm [thread:$0]  %s96_s24, 256, %s294_s1, [#allocation4], %s226_s16, %s226_s16, %s227_s17  }
  0x39   :  { %219 = dma.done.wait [#allocation4], 256  }
  0x3a   :  { %220 = vsyncadd [#allocation4], 4294967040 }
  0x3b   :  { %105 = vsyncpa [#allocation3], 1 }
  0x3c   :  { %106 = vsyncpa [#allocation4], 1 }

</bundles_post_ra>
